<compile_context>
chip_gen: v5e
topology: v5e:2x2
jax: 0.10.0
libtpu: 0.0.40
codegen_flags: <defaults>
</compile_context>

<pallas_src>
import numpy as np
import jax
import jax.numpy as jnp
from jax import lax
from jax.experimental import pallas as pl
from jax.experimental.pallas import tpu as pltpu


def _make_kernel(order, n_iter, eps, sweeps_per_check):
    M = order
    K = sweeps_per_check
    assert n_iter % K == 0
    n_outer = n_iter // K
    ramp = np.arange(order + 1)
    angle = ramp[:-1] * np.pi / (order / 2.0) + np.pi / (order * 2.0)
    cos_c = [float(v) for v in np.cos(angle)]     # Python scalars -> no array capture
    sin_c = [float(v) for v in np.sin(angle)]
    eps_sq = float(eps) * float(eps)              # 1e-28 is a normal f32

    def kernel(a_ref, xre_ref, xim_ref, conv_ref):
        a = a_ref[...]                            # (M+1, S, 128), batch on (sublane, lane)
        a0 = a[0]                                 # (S, 128)
        # Hoisted, loop-invariant normalized coefficient rows (full-vreg slabs).
        an_rows = tuple(a[k + 1] / a0 for k in range(M))

        # radius = max_{k>=1} 2*|an_k|^(1/(k+1)); pow via exp/log (0-safe, like torch.pow)
        if M >= 2:
            radius = None
            for k in range(1, M):
                t = jnp.abs(an_rows[k])
                e = 1.0 / float(k + 1)
                safe = jnp.where(t > 0.0, t, 1.0)
                p = 2.0 * jnp.where(t > 0.0, jnp.exp(e * jnp.log(safe)), 0.0)
                radius = p if radius is None else jnp.maximum(radius, p)
        else:
            radius = jnp.zeros_like(a0)
        center = -an_rows[0] / float(M)

        # Initial guess — matches torch exactly (incl. `center` on the imaginary part).
        xr0 = tuple(center + radius * cos_c[m] for m in range(M))
        xi0 = tuple(center + radius * sin_c[m] for m in range(M))

        def sweep(rows_r, rows_i):
            rows_r = list(rows_r)
            rows_i = list(rows_i)
            for m in range(M):                    # sequential Gauss-Seidel updates
                xm_re = rows_r[m]
                xm_im = rows_i[m]
                # Numerator: monic Horner of [1, an_0..an_{M-1}] at x_m.  x_m still holds
                # its sweep-entry value here, so this matches the reference evaluation.
                p_re = xm_re + an_rows[0]
                p_im = xm_im
                for k in range(1, M):
                    nr = p_re * xm_re - p_im * xm_im + an_rows[k]
                    ni = p_re * xm_im + p_im * xm_re
                    p_re, p_im = nr, ni
                # Denominator: prod_{j != m} (x_m - x_j); the j == m factor is exactly 1.
                d_re = d_im = None
                for j in range(M):
                    if j == m:
                        continue
                    wr = xm_re - rows_r[j]
                    wi = xm_im - rows_i[j]
                    if d_re is None:
                        d_re, d_im = wr, wi
                    else:
                        tr = d_re * wr - d_im * wi
                        ti = d_re * wi + d_im * wr
                        d_re, d_im = tr, ti
                if d_re is None:                  # M == 1: empty product -> denom == 1
                    delta_re, delta_im = p_re, p_im
                else:
                    # TODO(synk): no Smith-style scaling; |d|^2 can over/underflow in f32
                    # for extremely ill-conditioned root clusters (torch complex division
                    # is more robust there).
                    inv = pl.reciprocal(d_re * d_re + d_im * d_im, approx=True)  # EUP
                    delta_re = (p_re * d_re + p_im * d_im) * inv
                    delta_im = (p_im * d_re - p_re * d_im) * inv
                rows_r[m] = xm_re - delta_re      # direct row update (no one-hot/concat)
                rows_i[m] = xm_im - delta_im
            return tuple(rows_r), tuple(rows_i)

        def body(carry):
            i, rows_r, rows_i, _ = carry
            for _ in range(K - 1):                # unchecked sweeps (amortized check)
                rows_r, rows_i = sweep(rows_r, rows_i)
            prev_r, prev_i = rows_r, rows_i
            rows_r, rows_i = sweep(rows_r, rows_i)
            diff = None                           # per-element max_m |x_m - y_m|^2
            for m in range(M):
                dr = rows_r[m] - prev_r[m]
                di = rows_i[m] - prev_i[m]
                d2 = dr * dr + di * di
                diff = d2 if diff is None else jnp.maximum(diff, d2)
            return (i + 1, rows_r, rows_i, diff)

        def cond(carry):
            i, _, _, diff = carry
            return jnp.logical_and(
                i < n_outer,
                jnp.logical_or(i == 0, jnp.max(diff) > eps_sq))

        diff0 = jnp.full_like(a0, jnp.inf)
        _, rows_r, rows_i, diff = lax.while_loop(
            cond, body, (jnp.int32(0), xr0, xi0, diff0))

        for m in range(M):
            xre_ref[m] = rows_r[m]
            xim_ref[m] = rows_i[m]
        conv_ref[0] = (diff <= eps_sq).astype(jnp.float32)

    return kernel


def _choose_sublane_tile(order, n_rows):
    # Cap sublanes/block by vreg pressure of the unrolled Gauss-Seidel body
    # (~(3*order + 10) live (S,128) slabs, S/8 vregs each; keep under ~48 vregs).
    nv = max(1, 44 // (3 * order + 10))
    s_cap = 8
    while s_cap < 64 and s_cap * 2 <= 8 * nv:
        s_cap *= 2
    # Prefer a grid with >= 2 steps so both v7x TensorCores get work (neutral on v5e/v6e).
    cand = s_cap
    while cand >= 8:
        if (n_rows + cand - 1) // cand >= 2:
            return cand
        cand //= 2
    return max(8, min(s_cap, ((n_rows + 7) // 8) * 8))


def durand_kerner(a, order, n_iter=100, eps=1e-14, out_format="rectangular"):
    assert order >= 1 and n_iter >= 1 and eps >= 0
    assert a.shape[-1] == order + 1, "dimension of coefficients"
    batch_shape = a.shape[:-1]
    B = int(np.prod(batch_shape)) if len(batch_shape) else 1
    a2 = jnp.reshape(a, (B, order + 1)).astype(jnp.float32)

    # Lane-dense transposed layout, batch spread over (sublane, lane) = (row, 128).
    a_t = a2.T                                      # (order+1, B)
    n_rows = (B + 127) // 128
    S = _choose_sublane_tile(order, n_rows)
    n_rows_pad = ((n_rows + S - 1) // S) * S
    B_pad = n_rows_pad * 128
    if B_pad != B:
        # Edge padding replicates the last valid polynomial so padded lanes/rows behave
        # like duplicates and never poison the tile-wide convergence max.
        a_t = jnp.pad(a_t, ((0, 0), (0, B_pad - B)), mode="edge")
    a3 = a_t.reshape(order + 1, n_rows_pad, 128)

    # K sweeps per convergence check; keep n_iter semantics by requiring K | n_iter.
    K = 1
    if order < 16:                                  # bound unrolled body size for large order
        for cand in (4, 2):
            if n_iter % cand == 0:
                K = cand
                break

    kernel = _make_kernel(order, n_iter, float(eps), K)
    xr, xi, conv = pl.pallas_call(
        kernel,
        out_shape=(
            jax.ShapeDtypeStruct((order, n_rows_pad, 128), jnp.float32),
            jax.ShapeDtypeStruct((order, n_rows_pad, 128), jnp.float32),
            jax.ShapeDtypeStruct((1, n_rows_pad, 128), jnp.float32),
        ),
        grid=(n_rows_pad // S,),
        in_specs=[pl.BlockSpec((order + 1, S, 128), lambda i: (0, i, 0))],
        out_specs=(
            pl.BlockSpec((order, S, 128), lambda i: (0, i, 0)),
            pl.BlockSpec((order, S, 128), lambda i: (0, i, 0)),
            pl.BlockSpec((1, S, 128), lambda i: (0, i, 0)),
        ),
        compiler_params=pltpu.CompilerParams(
            dimension_semantics=("parallel",)),
    )(a3)

    xr2 = xr.reshape(order, B_pad)[:, :B]
    xi2 = xi.reshape(order, B_pad)[:, :B]
    x = (xr2 + 1j * xi2).T                          # (B, order) complex64
    if out_format in (1, "polar"):
        x = jnp.abs(x) + 1j * jnp.angle(x)
    elif out_format not in (0, "rectangular"):
        raise ValueError(f"out_format {out_format} is not supported")
    is_converged = conv.reshape(B_pad)[:B] > 0.5
    x = jnp.reshape(x, batch_shape + (order,))
    is_converged = jnp.reshape(is_converged, batch_shape)
    return x, is_converged


if __name__ == "__main__":
    # Docstring example: roots of 3x^2 + 4x + 5 -> -2/3 +/- 1.1055j
    a_ex = jnp.array([[3.0, 4.0, 5.0]], dtype=jnp.float32)
    x_ex, _ = durand_kerner(a_ex, order=2)
    x_ex = np.asarray(jax.block_until_ready(x_ex))[0]
    x_ex = x_ex[np.argsort(x_ex.imag)]
    expected = np.array([-2.0 / 3.0 - 1.1055416j, -2.0 / 3.0 + 1.1055416j])
    assert np.allclose(x_ex, expected, atol=1e-3), (x_ex, expected)

    # Batched random polynomials.
    key = jax.random.PRNGKey(0)
    order = 6
    B = 8
    a = jax.random.uniform(key, (B, order + 1), minval=-1.0, maxval=1.0,
                           dtype=jnp.float32)
    a = a.at[:, 0].set(jnp.abs(a[:, 0]) + 0.5)      # nonzero leading coefficient

    x, is_converged = durand_kerner(a, order, n_iter=100, eps=1e-14)
    x, is_converged = jax.block_until_ready((x, is_converged))

    assert x.shape == (B, order) and x.dtype == jnp.complex64
    assert is_converged.shape == (B,) and is_converged.dtype == jnp.bool_
    assert bool(jnp.all(jnp.isfinite(x.real)) & jnp.all(jnp.isfinite(x.imag)))
    print("KERNEL_OK")
</pallas_src>

<mosaic_0001>
module attributes {stable_mosaic.version = 11 : i64} {
  func.func @kernel(%arg0: i32, %arg1: memref<3x8x128xf32, #tpu.memory_space<vmem>>, %arg2: memref<2x8x128xf32, #tpu.memory_space<vmem>>, %arg3: memref<2x8x128xf32, #tpu.memory_space<vmem>>, %arg4: memref<1x8x128xf32, #tpu.memory_space<vmem>>) attributes {dimension_semantics = [#tpu.dimension_semantics<parallel>], iteration_bounds = array<i64: 1>, scalar_prefetch = 0 : i64, scratch_operands = 0 : i64, tpu.core_type = #tpu.core_type<tc>, window_params = [{transform_indices = @transform_0, window_bounds = array<i64: 3, 8, 128>}, {transform_indices = @transform_1, window_bounds = array<i64: 2, 8, 128>}, {transform_indices = @transform_2, window_bounds = array<i64: 2, 8, 128>}, {transform_indices = @transform_3, window_bounds = array<i64: 1, 8, 128>}]} {
    %c0 = arith.constant 0 : index
    %c0_0 = arith.constant 0 : index
    %c0_1 = arith.constant 0 : index
    %0 = vector.load %arg1[%c0, %c0_0, %c0_1] : memref<3x8x128xf32, #tpu.memory_space<vmem>>, vector<3x8x128xf32>
    %1 = vector.extract_strided_slice %0 {offsets = [0, 0, 0], sizes = [1, 8, 128], strides = [1, 1, 1]} : vector<3x8x128xf32> to vector<1x8x128xf32>
    %2 = vector.shape_cast %1 : vector<1x8x128xf32> to vector<8x128xf32>
    %3 = vector.extract_strided_slice %0 {offsets = [1, 0, 0], sizes = [1, 8, 128], strides = [1, 1, 1]} : vector<3x8x128xf32> to vector<1x8x128xf32>
    %4 = vector.shape_cast %3 : vector<1x8x128xf32> to vector<8x128xf32>
    %5 = arith.divf %4, %2 : vector<8x128xf32>
    %6 = vector.extract_strided_slice %0 {offsets = [2, 0, 0], sizes = [1, 8, 128], strides = [1, 1, 1]} : vector<3x8x128xf32> to vector<1x8x128xf32>
    %7 = vector.shape_cast %6 : vector<1x8x128xf32> to vector<8x128xf32>
    %8 = arith.divf %7, %2 : vector<8x128xf32>
    %9 = math.absf %8 : vector<8x128xf32>
    %cst = arith.constant 0.000000e+00 : f32
    %10 = vector.broadcast %cst : f32 to vector<8x128xf32>
    %11 = arith.cmpf ogt, %9, %10 : vector<8x128xf32>
    %cst_2 = arith.constant 1.000000e+00 : f32
    %12 = vector.broadcast %cst_2 : f32 to vector<8x128xf32>
    %13 = arith.select %11, %9, %12 : vector<8x128xi1>, vector<8x128xf32>
    %cst_3 = arith.constant 0.000000e+00 : f32
    %14 = vector.broadcast %cst_3 : f32 to vector<8x128xf32>
    %15 = arith.cmpf ogt, %9, %14 : vector<8x128xf32>
    %16 = math.log %13 : vector<8x128xf32>
    %cst_4 = arith.constant 5.000000e-01 : f32
    %17 = vector.broadcast %cst_4 : f32 to vector<8x128xf32>
    %18 = arith.mulf %17, %16 : vector<8x128xf32>
    %19 = math.exp %18 : vector<8x128xf32>
    %cst_5 = arith.constant 0.000000e+00 : f32
    %20 = vector.broadcast %cst_5 : f32 to vector<8x128xf32>
    %21 = arith.select %15, %19, %20 : vector<8x128xi1>, vector<8x128xf32>
    %cst_6 = arith.constant 2.000000e+00 : f32
    %22 = vector.broadcast %cst_6 : f32 to vector<8x128xf32>
    %23 = arith.mulf %22, %21 : vector<8x128xf32>
    %cst_7 = arith.constant 0.000000e+00 : f32
    %24 = vector.broadcast %cst_7 : f32 to vector<8x128xf32>
    %25 = arith.subf %24, %5 : vector<8x128xf32>
    %cst_8 = arith.constant 2.000000e+00 : f32
    %26 = vector.broadcast %cst_8 : f32 to vector<8x128xf32>
    %27 = arith.divf %25, %26 : vector<8x128xf32>
    %cst_9 = arith.constant 0.707106769 : f32
    %28 = vector.broadcast %cst_9 : f32 to vector<8x128xf32>
    %29 = arith.mulf %23, %28 : vector<8x128xf32>
    %30 = arith.addf %27, %29 : vector<8x128xf32>
    %cst_10 = arith.constant -0.707106769 : f32
    %31 = vector.broadcast %cst_10 : f32 to vector<8x128xf32>
    %32 = arith.mulf %23, %31 : vector<8x128xf32>
    %33 = arith.addf %27, %32 : vector<8x128xf32>
    %cst_11 = arith.constant 0.707106769 : f32
    %34 = vector.broadcast %cst_11 : f32 to vector<8x128xf32>
    %35 = arith.mulf %23, %34 : vector<8x128xf32>
    %36 = arith.addf %27, %35 : vector<8x128xf32>
    %cst_12 = arith.constant -0.707106769 : f32
    %37 = vector.broadcast %cst_12 : f32 to vector<8x128xf32>
    %38 = arith.mulf %23, %37 : vector<8x128xf32>
    %39 = arith.addf %27, %38 : vector<8x128xf32>
    %cst_13 = arith.constant 0x7F800000 : f32
    %40 = vector.broadcast %cst_13 : f32 to vector<8x128xf32>
    %c0_i32 = arith.constant 0 : i32
    %41:6 = scf.while (%arg5 = %c0_i32, %arg6 = %30, %arg7 = %33, %arg8 = %36, %arg9 = %39, %arg10 = %40) : (i32, vector<8x128xf32>, vector<8x128xf32>, vector<8x128xf32>, vector<8x128xf32>, vector<8x128xf32>) -> (i32, vector<8x128xf32>, vector<8x128xf32>, vector<8x128xf32>, vector<8x128xf32>, vector<8x128xf32>) {
      %c25_i32 = arith.constant 25 : i32
      %61 = arith.cmpi slt, %arg5, %c25_i32 : i32
      %c0_i32_29 = arith.constant 0 : i32
      %62 = arith.cmpi eq, %arg5, %c0_i32_29 : i32
      %63 = vector.shape_cast %arg10 : vector<8x128xf32> to vector<1x8x128xf32>
      %cst_30 = arith.constant dense<0xFF800000> : vector<1xf32>
      %64 = vector.multi_reduction <maximumf>, %63, %cst_30 [1, 2] : vector<1x8x128xf32> to vector<1xf32>
      %65 = vector.shape_cast %64 : vector<1xf32> to vector<1x1x1xf32>
      %66 = vector.extract %65[0, 0, 0] : f32 from vector<1x1x1xf32>
      %cst_31 = arith.constant 1.000000e-28 : f32
      %67 = arith.cmpf ogt, %66, %cst_31 : f32
      %68 = arith.ori %62, %67 : i1
      %69 = arith.andi %61, %68 : i1
      scf.condition(%69) %arg5, %arg6, %arg7, %arg8, %arg9, %arg10 : i32, vector<8x128xf32>, vector<8x128xf32>, vector<8x128xf32>, vector<8x128xf32>, vector<8x128xf32>
    } do {
    ^bb0(%arg5: i32, %arg6: vector<8x128xf32>, %arg7: vector<8x128xf32>, %arg8: vector<8x128xf32>, %arg9: vector<8x128xf32>, %arg10: vector<8x128xf32>):
      %61 = arith.addf %arg6, %5 : vector<8x128xf32>
      %62 = arith.mulf %61, %arg6 : vector<8x128xf32>
      %63 = arith.mulf %arg8, %arg8 : vector<8x128xf32>
      %64 = arith.subf %62, %63 : vector<8x128xf32>
      %65 = arith.addf %64, %8 : vector<8x128xf32>
      %66 = arith.mulf %61, %arg8 : vector<8x128xf32>
      %67 = arith.mulf %arg8, %arg6 : vector<8x128xf32>
      %68 = arith.addf %66, %67 : vector<8x128xf32>
      %69 = arith.subf %arg6, %arg7 : vector<8x128xf32>
      %70 = arith.subf %arg8, %arg9 : vector<8x128xf32>
      %71 = arith.mulf %69, %69 : vector<8x128xf32>
      %72 = arith.mulf %70, %70 : vector<8x128xf32>
      %73 = arith.addf %71, %72 : vector<8x128xf32>
      %74 = tpu.reciprocal %73 {approx = true} : vector<8x128xf32> -> vector<8x128xf32>
      %75 = arith.mulf %65, %69 : vector<8x128xf32>
      %76 = arith.mulf %68, %70 : vector<8x128xf32>
      %77 = arith.addf %75, %76 : vector<8x128xf32>
      %78 = arith.mulf %77, %74 : vector<8x128xf32>
      %79 = arith.mulf %68, %69 : vector<8x128xf32>
      %80 = arith.mulf %65, %70 : vector<8x128xf32>
      %81 = arith.subf %79, %80 : vector<8x128xf32>
      %82 = arith.mulf %81, %74 : vector<8x128xf32>
      %83 = arith.subf %arg6, %78 : vector<8x128xf32>
      %84 = arith.subf %arg8, %82 : vector<8x128xf32>
      %85 = arith.addf %arg7, %5 : vector<8x128xf32>
      %86 = arith.mulf %85, %arg7 : vector<8x128xf32>
      %87 = arith.mulf %arg9, %arg9 : vector<8x128xf32>
      %88 = arith.subf %86, %87 : vector<8x128xf32>
      %89 = arith.addf %88, %8 : vector<8x128xf32>
      %90 = arith.mulf %85, %arg9 : vector<8x128xf32>
      %91 = arith.mulf %arg9, %arg7 : vector<8x128xf32>
      %92 = arith.addf %90, %91 : vector<8x128xf32>
      %93 = arith.subf %arg7, %83 : vector<8x128xf32>
      %94 = arith.subf %arg9, %84 : vector<8x128xf32>
      %95 = arith.mulf %93, %93 : vector<8x128xf32>
      %96 = arith.mulf %94, %94 : vector<8x128xf32>
      %97 = arith.addf %95, %96 : vector<8x128xf32>
      %98 = tpu.reciprocal %97 {approx = true} : vector<8x128xf32> -> vector<8x128xf32>
      %99 = arith.mulf %89, %93 : vector<8x128xf32>
      %100 = arith.mulf %92, %94 : vector<8x128xf32>
      %101 = arith.addf %99, %100 : vector<8x128xf32>
      %102 = arith.mulf %101, %98 : vector<8x128xf32>
      %103 = arith.mulf %92, %93 : vector<8x128xf32>
      %104 = arith.mulf %89, %94 : vector<8x128xf32>
      %105 = arith.subf %103, %104 : vector<8x128xf32>
      %106 = arith.mulf %105, %98 : vector<8x128xf32>
      %107 = arith.subf %arg7, %102 : vector<8x128xf32>
      %108 = arith.subf %arg9, %106 : vector<8x128xf32>
      %109 = arith.addf %83, %5 : vector<8x128xf32>
      %110 = arith.mulf %109, %83 : vector<8x128xf32>
      %111 = arith.mulf %84, %84 : vector<8x128xf32>
      %112 = arith.subf %110, %111 : vector<8x128xf32>
      %113 = arith.addf %112, %8 : vector<8x128xf32>
      %114 = arith.mulf %109, %84 : vector<8x128xf32>
      %115 = arith.mulf %84, %83 : vector<8x128xf32>
      %116 = arith.addf %114, %115 : vector<8x128xf32>
      %117 = arith.subf %83, %107 : vector<8x128xf32>
      %118 = arith.subf %84, %108 : vector<8x128xf32>
      %119 = arith.mulf %117, %117 : vector<8x128xf32>
      %120 = arith.mulf %118, %118 : vector<8x128xf32>
      %121 = arith.addf %119, %120 : vector<8x128xf32>
      %122 = tpu.reciprocal %121 {approx = true} : vector<8x128xf32> -> vector<8x128xf32>
      %123 = arith.mulf %113, %117 : vector<8x128xf32>
      %124 = arith.mulf %116, %118 : vector<8x128xf32>
      %125 = arith.addf %123, %124 : vector<8x128xf32>
      %126 = arith.mulf %125, %122 : vector<8x128xf32>
      %127 = arith.mulf %116, %117 : vector<8x128xf32>
      %128 = arith.mulf %113, %118 : vector<8x128xf32>
      %129 = arith.subf %127, %128 : vector<8x128xf32>
      %130 = arith.mulf %129, %122 : vector<8x128xf32>
      %131 = arith.subf %83, %126 : vector<8x128xf32>
      %132 = arith.subf %84, %130 : vector<8x128xf32>
      %133 = arith.addf %107, %5 : vector<8x128xf32>
      %134 = arith.mulf %133, %107 : vector<8x128xf32>
      %135 = arith.mulf %108, %108 : vector<8x128xf32>
      %136 = arith.subf %134, %135 : vector<8x128xf32>
      %137 = arith.addf %136, %8 : vector<8x128xf32>
      %138 = arith.mulf %133, %108 : vector<8x128xf32>
      %139 = arith.mulf %108, %107 : vector<8x128xf32>
      %140 = arith.addf %138, %139 : vector<8x128xf32>
      %141 = arith.subf %107, %131 : vector<8x128xf32>
      %142 = arith.subf %108, %132 : vector<8x128xf32>
      %143 = arith.mulf %141, %141 : vector<8x128xf32>
      %144 = arith.mulf %142, %142 : vector<8x128xf32>
      %145 = arith.addf %143, %144 : vector<8x128xf32>
      %146 = tpu.reciprocal %145 {approx = true} : vector<8x128xf32> -> vector<8x128xf32>
      %147 = arith.mulf %137, %141 : vector<8x128xf32>
      %148 = arith.mulf %140, %142 : vector<8x128xf32>
      %149 = arith.addf %147, %148 : vector<8x128xf32>
      %150 = arith.mulf %149, %146 : vector<8x128xf32>
      %151 = arith.mulf %140, %141 : vector<8x128xf32>
      %152 = arith.mulf %137, %142 : vector<8x128xf32>
      %153 = arith.subf %151, %152 : vector<8x128xf32>
      %154 = arith.mulf %153, %146 : vector<8x128xf32>
      %155 = arith.subf %107, %150 : vector<8x128xf32>
      %156 = arith.subf %108, %154 : vector<8x128xf32>
      %157 = arith.addf %131, %5 : vector<8x128xf32>
      %158 = arith.mulf %157, %131 : vector<8x128xf32>
      %159 = arith.mulf %132, %132 : vector<8x128xf32>
      %160 = arith.subf %158, %159 : vector<8x128xf32>
      %161 = arith.addf %160, %8 : vector<8x128xf32>
      %162 = arith.mulf %157, %132 : vector<8x128xf32>
      %163 = arith.mulf %132, %131 : vector<8x128xf32>
      %164 = arith.addf %162, %163 : vector<8x128xf32>
      %165 = arith.subf %131, %155 : vector<8x128xf32>
      %166 = arith.subf %132, %156 : vector<8x128xf32>
      %167 = arith.mulf %165, %165 : vector<8x128xf32>
      %168 = arith.mulf %166, %166 : vector<8x128xf32>
      %169 = arith.addf %167, %168 : vector<8x128xf32>
      %170 = tpu.reciprocal %169 {approx = true} : vector<8x128xf32> -> vector<8x128xf32>
      %171 = arith.mulf %161, %165 : vector<8x128xf32>
      %172 = arith.mulf %164, %166 : vector<8x128xf32>
      %173 = arith.addf %171, %172 : vector<8x128xf32>
      %174 = arith.mulf %173, %170 : vector<8x128xf32>
      %175 = arith.mulf %164, %165 : vector<8x128xf32>
      %176 = arith.mulf %161, %166 : vector<8x128xf32>
      %177 = arith.subf %175, %176 : vector<8x128xf32>
      %178 = arith.mulf %177, %170 : vector<8x128xf32>
      %179 = arith.subf %131, %174 : vector<8x128xf32>
      %180 = arith.subf %132, %178 : vector<8x128xf32>
      %181 = arith.addf %155, %5 : vector<8x128xf32>
      %182 = arith.mulf %181, %155 : vector<8x128xf32>
      %183 = arith.mulf %156, %156 : vector<8x128xf32>
      %184 = arith.subf %182, %183 : vector<8x128xf32>
      %185 = arith.addf %184, %8 : vector<8x128xf32>
      %186 = arith.mulf %181, %156 : vector<8x128xf32>
      %187 = arith.mulf %156, %155 : vector<8x128xf32>
      %188 = arith.addf %186, %187 : vector<8x128xf32>
      %189 = arith.subf %155, %179 : vector<8x128xf32>
      %190 = arith.subf %156, %180 : vector<8x128xf32>
      %191 = arith.mulf %189, %189 : vector<8x128xf32>
      %192 = arith.mulf %190, %190 : vector<8x128xf32>
      %193 = arith.addf %191, %192 : vector<8x128xf32>
      %194 = tpu.reciprocal %193 {approx = true} : vector<8x128xf32> -> vector<8x128xf32>
      %195 = arith.mulf %185, %189 : vector<8x128xf32>
      %196 = arith.mulf %188, %190 : vector<8x128xf32>
      %197 = arith.addf %195, %196 : vector<8x128xf32>
      %198 = arith.mulf %197, %194 : vector<8x128xf32>
      %199 = arith.mulf %188, %189 : vector<8x128xf32>
      %200 = arith.mulf %185, %190 : vector<8x128xf32>
      %201 = arith.subf %199, %200 : vector<8x128xf32>
      %202 = arith.mulf %201, %194 : vector<8x128xf32>
      %203 = arith.subf %155, %198 : vector<8x128xf32>
      %204 = arith.subf %156, %202 : vector<8x128xf32>
      %205 = arith.addf %179, %5 : vector<8x128xf32>
      %206 = arith.mulf %205, %179 : vector<8x128xf32>
      %207 = arith.mulf %180, %180 : vector<8x128xf32>
      %208 = arith.subf %206, %207 : vector<8x128xf32>
      %209 = arith.addf %208, %8 : vector<8x128xf32>
      %210 = arith.mulf %205, %180 : vector<8x128xf32>
      %211 = arith.mulf %180, %179 : vector<8x128xf32>
      %212 = arith.addf %210, %211 : vector<8x128xf32>
      %213 = arith.subf %179, %203 : vector<8x128xf32>
      %214 = arith.subf %180, %204 : vector<8x128xf32>
      %215 = arith.mulf %213, %213 : vector<8x128xf32>
      %216 = arith.mulf %214, %214 : vector<8x128xf32>
      %217 = arith.addf %215, %216 : vector<8x128xf32>
      %218 = tpu.reciprocal %217 {approx = true} : vector<8x128xf32> -> vector<8x128xf32>
      %219 = arith.mulf %209, %213 : vector<8x128xf32>
      %220 = arith.mulf %212, %214 : vector<8x128xf32>
      %221 = arith.addf %219, %220 : vector<8x128xf32>
      %222 = arith.mulf %221, %218 : vector<8x128xf32>
      %223 = arith.mulf %212, %213 : vector<8x128xf32>
      %224 = arith.mulf %209, %214 : vector<8x128xf32>
      %225 = arith.subf %223, %224 : vector<8x128xf32>
      %226 = arith.mulf %225, %218 : vector<8x128xf32>
      %227 = arith.subf %179, %222 : vector<8x128xf32>
      %228 = arith.subf %180, %226 : vector<8x128xf32>
      %229 = arith.addf %203, %5 : vector<8x128xf32>
      %230 = arith.mulf %229, %203 : vector<8x128xf32>
      %231 = arith.mulf %204, %204 : vector<8x128xf32>
      %232 = arith.subf %230, %231 : vector<8x128xf32>
      %233 = arith.addf %232, %8 : vector<8x128xf32>
      %234 = arith.mulf %229, %204 : vector<8x128xf32>
      %235 = arith.mulf %204, %203 : vector<8x128xf32>
      %236 = arith.addf %234, %235 : vector<8x128xf32>
      %237 = arith.subf %203, %227 : vector<8x128xf32>
      %238 = arith.subf %204, %228 : vector<8x128xf32>
      %239 = arith.mulf %237, %237 : vector<8x128xf32>
      %240 = arith.mulf %238, %238 : vector<8x128xf32>
      %241 = arith.addf %239, %240 : vector<8x128xf32>
      %242 = tpu.reciprocal %241 {approx = true} : vector<8x128xf32> -> vector<8x128xf32>
      %243 = arith.mulf %233, %237 : vector<8x128xf32>
      %244 = arith.mulf %236, %238 : vector<8x128xf32>
      %245 = arith.addf %243, %244 : vector<8x128xf32>
      %246 = arith.mulf %245, %242 : vector<8x128xf32>
      %247 = arith.mulf %236, %237 : vector<8x128xf32>
      %248 = arith.mulf %233, %238 : vector<8x128xf32>
      %249 = arith.subf %247, %248 : vector<8x128xf32>
      %250 = arith.mulf %249, %242 : vector<8x128xf32>
      %251 = arith.subf %203, %246 : vector<8x128xf32>
      %252 = arith.subf %204, %250 : vector<8x128xf32>
      %253 = arith.subf %227, %179 : vector<8x128xf32>
      %254 = arith.subf %228, %180 : vector<8x128xf32>
      %255 = arith.mulf %253, %253 : vector<8x128xf32>
      %256 = arith.mulf %254, %254 : vector<8x128xf32>
      %257 = arith.addf %255, %256 : vector<8x128xf32>
      %258 = arith.subf %251, %203 : vector<8x128xf32>
      %259 = arith.subf %252, %204 : vector<8x128xf32>
      %260 = arith.mulf %258, %258 : vector<8x128xf32>
      %261 = arith.mulf %259, %259 : vector<8x128xf32>
      %262 = arith.addf %260, %261 : vector<8x128xf32>
      %263 = arith.maximumf %257, %262 : vector<8x128xf32>
      %c1_i32 = arith.constant 1 : i32
      %264 = arith.addi %arg5, %c1_i32 : i32
      scf.yield %264, %227, %251, %228, %252, %263 : i32, vector<8x128xf32>, vector<8x128xf32>, vector<8x128xf32>, vector<8x128xf32>, vector<8x128xf32>
    }
    %c0_14 = arith.constant 0 : index
    %c0_15 = arith.constant 0 : index
    %c0_16 = arith.constant 0 : index
    %42 = vector.load %arg2[%c0_14, %c0_15, %c0_16] : memref<2x8x128xf32, #tpu.memory_space<vmem>>, vector<1x8x128xf32>
    %43 = vector.shape_cast %42 : vector<1x8x128xf32> to vector<8x128xf32>
    %44 = vector.shape_cast %41#1 : vector<8x128xf32> to vector<1x8x128xf32>
    tpu.vector_store %arg2[%c0_14, %c0_15, %c0_16], %44 {strides = array<i32>} : memref<2x8x128xf32, #tpu.memory_space<vmem>>, vector<1x8x128xf32>,
    %c0_17 = arith.constant 0 : index
    %c0_18 = arith.constant 0 : index
    %c0_19 = arith.constant 0 : index
    %45 = vector.load %arg3[%c0_17, %c0_18, %c0_19] : memref<2x8x128xf32, #tpu.memory_space<vmem>>, vector<1x8x128xf32>
    %46 = vector.shape_cast %45 : vector<1x8x128xf32> to vector<8x128xf32>
    %47 = vector.shape_cast %41#3 : vector<8x128xf32> to vector<1x8x128xf32>
    tpu.vector_store %arg3[%c0_17, %c0_18, %c0_19], %47 {strides = array<i32>} : memref<2x8x128xf32, #tpu.memory_space<vmem>>, vector<1x8x128xf32>,
    %c1 = arith.constant 1 : index
    %c0_20 = arith.constant 0 : index
    %c0_21 = arith.constant 0 : index
    %48 = vector.load %arg2[%c1, %c0_20, %c0_21] : memref<2x8x128xf32, #tpu.memory_space<vmem>>, vector<1x8x128xf32>
    %49 = vector.shape_cast %48 : vector<1x8x128xf32> to vector<8x128xf32>
    %50 = vector.shape_cast %41#2 : vector<8x128xf32> to vector<1x8x128xf32>
    tpu.vector_store %arg2[%c1, %c0_20, %c0_21], %50 {strides = array<i32>} : memref<2x8x128xf32, #tpu.memory_space<vmem>>, vector<1x8x128xf32>,
    %c1_22 = arith.constant 1 : index
    %c0_23 = arith.constant 0 : index
    %c0_24 = arith.constant 0 : index
    %51 = vector.load %arg3[%c1_22, %c0_23, %c0_24] : memref<2x8x128xf32, #tpu.memory_space<vmem>>, vector<1x8x128xf32>
    %52 = vector.shape_cast %51 : vector<1x8x128xf32> to vector<8x128xf32>
    %53 = vector.shape_cast %41#4 : vector<8x128xf32> to vector<1x8x128xf32>
    tpu.vector_store %arg3[%c1_22, %c0_23, %c0_24], %53 {strides = array<i32>} : memref<2x8x128xf32, #tpu.memory_space<vmem>>, vector<1x8x128xf32>,
    %cst_25 = arith.constant 1.000000e-28 : f32
    %54 = vector.broadcast %cst_25 : f32 to vector<8x128xf32>
    %55 = arith.cmpf ole, %41#5, %54 : vector<8x128xf32>
    %56 = arith.extui %55 : vector<8x128xi1> to vector<8x128xi32>
    %57 = arith.sitofp %56 : vector<8x128xi32> to vector<8x128xf32>
    %c0_26 = arith.constant 0 : index
    %c0_27 = arith.constant 0 : index
    %c0_28 = arith.constant 0 : index
    %58 = vector.load %arg4[%c0_26, %c0_27, %c0_28] : memref<1x8x128xf32, #tpu.memory_space<vmem>>, vector<1x8x128xf32>
    %59 = vector.shape_cast %58 : vector<1x8x128xf32> to vector<8x128xf32>
    %60 = vector.shape_cast %57 : vector<8x128xf32> to vector<1x8x128xf32>
    tpu.vector_store %arg4[%c0_26, %c0_27, %c0_28], %60 {strides = array<i32>} : memref<1x8x128xf32, #tpu.memory_space<vmem>>, vector<1x8x128xf32>,
    return
  }
  func.func @transform_0(%arg0: i32) -> (i32, i32, i32) {
    %c0_i32 = arith.constant 0 : i32
    %c0_i32_0 = arith.constant 0 : i32
    %c0_i32_1 = arith.constant 0 : i32
    return %c0_i32, %arg0, %c0_i32_0 : i32, i32, i32
  }
  func.func @transform_1(%arg0: i32) -> (i32, i32, i32) {
    %c0_i32 = arith.constant 0 : i32
    %c0_i32_0 = arith.constant 0 : i32
    %c0_i32_1 = arith.constant 0 : i32
    return %c0_i32, %arg0, %c0_i32_0 : i32, i32, i32
  }
  func.func @transform_2(%arg0: i32) -> (i32, i32, i32) {
    %c0_i32 = arith.constant 0 : i32
    %c0_i32_0 = arith.constant 0 : i32
    %c0_i32_1 = arith.constant 0 : i32
    return %c0_i32, %arg0, %c0_i32_0 : i32, i32, i32
  }
  func.func @transform_3(%arg0: i32) -> (i32, i32, i32) {
    %c0_i32 = arith.constant 0 : i32
    %c0_i32_0 = arith.constant 0 : i32
    %c0_i32_1 = arith.constant 0 : i32
    return %c0_i32, %arg0, %c0_i32_0 : i32, i32, i32
  }
}

</mosaic_0001>

<bundles_post_ra>
// kernel: tpu_custom_call.1
= control target key start
LH: loop header
LB: loop body
LE: loop exit
PB: predicated region body
PF: predicated region fallthrough
CT: control target
= control target key end

     0   :  { %9 = vsyncpa [#allocation3], 0  ;;  %s739_s0 = inlined_call_operand.hbm [shape: f32[3,8,128], index: 0, kind: input, shape index: {}]   ;;  %s740_s1 = inlined_call_operand.hbm [shape: f32[2,8,128], index: 1, kind: output, shape index: {0}]   ;;  %s741_s2 = inlined_call_operand.hbm [shape: f32[2,8,128], index: 2, kind: output, shape index: {1}]   ;;  %s742_s3 = inlined_call_operand.hbm [shape: f32[1,8,128], index: 3, kind: output, shape index: {2}]  }
   0x1   :  { %10 = vsyncpa [#allocation4], 0 }
   0x2   :  { %11 = vsyncpa [#allocation7], 0  ;;  %s16_s14 = sshll.u32 %s739_s0, 4  ;;  %s611_s15 = smov [#allocation2]   ;;  %s17_s14 = int_to_ptr.hbm [resolvable:$true] %s16_s14 }
   0x3   :  { %s18_s16 = sshll.u32 %s611_s15, 4  ;;  %s612_s17 = smov 128   ;;  %s19_s16 = int_to_ptr.vmem [resolvable:$true] %s18_s16 }
   0x4   :  { %s613_s18 = smov 8  }
   0x5   :  { %24 = dma.hbm_to_vmem [thread:$0]  %s17_s14, 384, %s19_s16, [#allocation3], %s612_s17, %s612_s17, %s613_s18  }
   0x6   :  { %585 = dma.done.wait [#allocation3], 384  }
   0x7   :  { %586 = vsyncadd [#allocation3], 4294966912  ;;  %v29_v0 = vld [vmem:[#allocation2] sm:$0xff]  ;;  %v31_v9 = vld [vmem:[#allocation2 + $0x10] sm:$0xff]  ;;  %v614_v12 = vmov 2.0   ;;  %s667_s0 = smov 0  }
   0x8   :  { %445 = vrcp.f32 %v29_v0  ;;  %v43_v3 = vand.u32 2147483648, %v29_v0  ;;  %vm37_vm0 = vweird.f32 %v29_v0  ;;  %v41_v5 = vand.u32 2147483647, %v29_v0  ;;  %v30_v23 = vld [vmem:[#allocation2 + $0x8] sm:$0xff] }
   0x9   :  { %447 = vrcp.f32 %v614_v12 }
   0xa   :  { %v44_v7 = vor.u32 1.1754944e-38, %v43_v3  ;;  %vm42_vm3 = vcmp.eq.f32.partialorder %v41_v5, 8.507059e+37 }
   0xe   :  { %v446_v1 = vpop.eup %445 }
   0xf   :  { %v33_v2 = vmul.f32 %v446_v1, %v29_v0  ;;  %vm38_vm1 = vweird.f32 %v446_v1  ;;  %v448_v16 = vpop.eup %447 }
  0x10   :  { %vm39_vm2 = vmor %vm37_vm0, %vm38_vm1  ;;  %v60_v18 = vmul.f32 2.0, %v448_v16  ;;  %vm64_vm5 = vweird.f32 %v448_v16 }
  0x11   :  { %v34_v4 = vsub.f32 1.0, %v33_v2 }
  0x12   :  { %v61_v20 = vsub.f32 1.0, %v60_v18 }
  0x13   :  { %v35_v6 = vmul.f32 %v446_v1, %v34_v4 }
  0x14   :  { %v62_v24 = vmul.f32 %v448_v16, %v61_v20 }
  0x15   :  { %v36_v8 = vadd.f32 %v446_v1, %v35_v6 }
  0x16   :  { %v63_v27 = vadd.f32 %v448_v16, %v62_v24 }
  0x17   :  { %v40_v10 = vsel %vm39_vm2, %v446_v1, %v36_v8 }
  0x18   :  { %v45_v11 = vsel %vm42_vm3, %v44_v7, %v40_v10  ;;  %v65_v29 = vsel %vm64_vm5, %v448_v16, %v63_v27 }
  0x19   :  { %v645_v13 = vmul.f32 %v45_v11, %v31_v9  ;;  %v654_v26 = vmul.f32 %v45_v11, %v30_v23 }
  0x1b   :  { %v48_v14 = vand.u32 2147483647, %v645_v13  ;;  %v58_v28 = vsub.f32 0.0, %v654_v26 }
  0x1d   :  { %vm648_vm4 = vcmp.gt.f32.partialorder %v48_v14, 0.0  ;;  %v66_v33 = vmul.f32 %v65_v29, %v58_v28 }
  0x1e   :  { %v50_v17 = vsel %vm648_vm4, %v48_v14, 1.0 }
  0x1f   :  { %449 = vlog2.f32 %v50_v17 }
  0x25   :  { %v450_v19 = vpop.eup %449 }
  0x26   :  { %v52_v21 = vmul.f32 0.6931472, %v450_v19 }
  0x28   :  { %v53_v22 = vmul.f32 0.5, %v52_v21 }
  0x2a   :  { %v54_v25 = vmul.f32 1.442695, %v53_v22 }
  0x2c   :  { %451 = vpow2.f32 %v54_v25 }
  0x32   :  { %v452_v30 = vpop.eup %451 }
  0x33   :  { %v56_v31 = vsel %vm648_vm4, %v452_v30, 0.0 }
  0x34   :  { %v57_v32 = vmul.f32 2.0, %v56_v31 }
  0x36   :  { %v67_v34 = vmul.f32 0.70710677, %v57_v32  ;;  %v69_v35 = vmul.f32 -0.70710677, %v57_v32 }
  0x38   :  { %v68_v36 = vadd.f32 %v67_v34, %v66_v33   ;;  %v70_v37 = vadd.f32 %v69_v35, %v66_v33  }
  0x3a   :  { %v745_v38 = vmov %v70_v37  ;;  %v746_v39 = vmov %v68_v36 }
  0x3b LB: > { %v95_v40 = vadd.f32 %v605_v36, %v654_v26  ;;  %v97_v41 = vmul.f32 %v597_v39, %v597_v39  ;;  %v101_v42 = vmul.f32 %v597_v39, %v605_v36  ;;  %v103_v43 = vsub.f32 %v605_v36, %v601_v37  ;;  %s677_s0 = sadd.s32 1, %s609_s0   ;;  %s609_s0 = sphi %s667_s0, %s677_s0   ;;  %v605_v36 = vphi %v68_v36, %v750_v36   ;;  %v601_v37 = vphi %v70_v37, %v749_v37   ;;  %v597_v39 = vphi %v746_v39, %v748_v39   ;;  %v593_v38 = vphi %v745_v38, %v747_v38  }
  0x3c   : > { %v104_v44 = vsub.f32 %v597_v39, %v593_v38  ;;  %v119_v55 = vadd.f32 %v601_v37, %v654_v26  ;;  %v121_v61 = vmul.f32 %v593_v38, %v593_v38  ;;  %v125_v3 = vmul.f32 %v593_v38, %v601_v37  ;;  %p79_p0 = scmp.eq.s32.totalorder %s677_s0, 0  ;;  %p78_p1 = scmp.lt.s32.totalorder %s677_s0, 25 }
  0x3d   : > { %v96_v45 = vmul.f32 %v605_v36, %v95_v40  ;;  %v100_v46 = vmul.f32 %v597_v39, %v95_v40  ;;  %v105_v47 = vmul.f32 %v103_v43, %v103_v43 }
  0x3e   : > { %v106_v48 = vmul.f32 %v104_v44, %v104_v44  ;;  %v120_v60 = vmul.f32 %v601_v37, %v119_v55  ;;  %v124_v2 = vmul.f32 %v593_v38, %v119_v55 }
  0x3f   : > { %v98_v49 = vsub.f32 %v96_v45, %v97_v41  ;;  %v102_v50 = vadd.f32 %v101_v42, %v100_v46 }
  0x40   : > { %v107_v51 = vadd.f32 %v106_v48, %v105_v47  ;;  %v122_v1 = vsub.f32 %v120_v60, %v121_v61  ;;  %v126_v9 = vadd.f32 %v125_v3, %v124_v2 }
  0x41   : > { %v99_v52 = vadd.f32 %v98_v49, %v645_v13  ;;  %v110_v53 = vmul.f32 %v104_v44, %v102_v50  ;;  %v113_v54 = vmul.f32 %v103_v43, %v102_v50 }
  0x42   : > { %453 = vrcp.f32 %v107_v51  ;;  %v123_v8 = vadd.f32 %v122_v1, %v645_v13 }
  0x43   : > { %v109_v56 = vmul.f32 %v103_v43, %v99_v52  ;;  %v114_v57 = vmul.f32 %v104_v44, %v99_v52 }
  0x45   : > { %v111_v58 = vadd.f32 %v110_v53, %v109_v56  ;;  %v115_v59 = vsub.f32 %v113_v54, %v114_v57 }
  0x48   : > { %v454_v62 = vpop.eup %453 }
  0x49   : > { %v112_v63 = vmul.f32 %v454_v62, %v111_v58  ;;  %v116_v0 = vmul.f32 %v454_v62, %v115_v59 }
  0x4b   : > { %v117_v4 = vsub.f32 %v605_v36, %v112_v63  ;;  %v118_v5 = vsub.f32 %v597_v39, %v116_v0 }
  0x4d   : > { %v127_v6 = vsub.f32 %v601_v37, %v117_v4  ;;  %v128_v7 = vsub.f32 %v593_v38, %v118_v5  ;;  %v143_v18 = vadd.f32 %v117_v4, %v654_v26  ;;  %v145_v22 = vmul.f32 %v118_v5, %v118_v5 }
  0x4e   : > { %v149_v29 = vmul.f32 %v118_v5, %v117_v4 }
  0x4f   : > { %v129_v10 = vmul.f32 %v127_v6, %v127_v6  ;;  %v130_v11 = vmul.f32 %v128_v7, %v128_v7  ;;  %v133_v14 = vmul.f32 %v127_v6, %v123_v8  ;;  %v134_v15 = vmul.f32 %v128_v7, %v126_v9 }
  0x50   : > { %v137_v16 = vmul.f32 %v127_v6, %v126_v9  ;;  %v138_v17 = vmul.f32 %v128_v7, %v123_v8  ;;  %v144_v21 = vmul.f32 %v143_v18, %v117_v4  ;;  %v148_v28 = vmul.f32 %v143_v18, %v118_v5 }
  0x51   : > { %v131_v12 = vadd.f32 %v130_v11, %v129_v10  ;;  %v135_v19 = vadd.f32 %v134_v15, %v133_v14 }
  0x52   : > { %v139_v20 = vsub.f32 %v137_v16, %v138_v17  ;;  %v146_v27 = vsub.f32 %v144_v21, %v145_v22  ;;  %v150_v35 = vadd.f32 %v149_v29, %v148_v28 }
  0x53   : > { %455 = vrcp.f32 %v131_v12 }
  0x54   : > { %v147_v34 = vadd.f32 %v146_v27, %v645_v13 }
  0x59   : > { %v456_v23 = vpop.eup %455 }
  0x5a   : > { %v136_v24 = vmul.f32 %v456_v23, %v135_v19  ;;  %v140_v25 = vmul.f32 %v456_v23, %v139_v20 }
  0x5c   : > { %v141_v30 = vsub.f32 %v601_v37, %v136_v24  ;;  %v142_v31 = vsub.f32 %v593_v38, %v140_v25 }
  0x5e   : > { %v151_v32 = vsub.f32 %v117_v4, %v141_v30  ;;  %v152_v33 = vsub.f32 %v118_v5, %v142_v31  ;;  %v167_v45 = vadd.f32 %v141_v30, %v654_v26  ;;  %v169_v37 = vmul.f32 %v142_v31, %v142_v31 }
  0x5f   : > { %v173_v53 = vmul.f32 %v142_v31, %v141_v30 }
  0x60   : > { %v153_v36 = vmul.f32 %v151_v32, %v151_v32  ;;  %v154_v39 = vmul.f32 %v152_v33, %v152_v33  ;;  %v157_v41 = vmul.f32 %v151_v32, %v147_v34  ;;  %v158_v42 = vmul.f32 %v152_v33, %v150_v35 }
  0x61   : > { %v161_v43 = vmul.f32 %v151_v32, %v150_v35  ;;  %v162_v44 = vmul.f32 %v152_v33, %v147_v34  ;;  %v168_v48 = vmul.f32 %v167_v45, %v141_v30  ;;  %v172_v52 = vmul.f32 %v167_v45, %v142_v31 }
  0x62   : > { %v155_v40 = vadd.f32 %v154_v39, %v153_v36  ;;  %v159_v46 = vadd.f32 %v158_v42, %v157_v41 }
  0x63   : > { %v163_v47 = vsub.f32 %v161_v43, %v162_v44  ;;  %v170_v51 = vsub.f32 %v168_v48, %v169_v37  ;;  %v174_v59 = vadd.f32 %v173_v53, %v172_v52 }
  0x64   : > { %457 = vrcp.f32 %v155_v40 }
  0x65   : > { %v171_v58 = vadd.f32 %v170_v51, %v645_v13 }
  0x6a   : > { %v458_v38 = vpop.eup %457 }
  0x6b   : > { %v160_v49 = vmul.f32 %v458_v38, %v159_v46  ;;  %v164_v50 = vmul.f32 %v458_v38, %v163_v47 }
  0x6d   : > { %v165_v54 = vsub.f32 %v117_v4, %v160_v49  ;;  %v166_v55 = vsub.f32 %v118_v5, %v164_v50 }
  0x6f   : > { %v175_v56 = vsub.f32 %v141_v30, %v165_v54  ;;  %v176_v57 = vsub.f32 %v142_v31, %v166_v55  ;;  %v191_v3 = vadd.f32 %v165_v54, %v654_v26  ;;  %v193_v4 = vmul.f32 %v166_v55, %v166_v55 }
  0x70   : > { %v197_v14 = vmul.f32 %v166_v55, %v165_v54 }
  0x71   : > { %v177_v60 = vmul.f32 %v175_v56, %v175_v56  ;;  %v178_v61 = vmul.f32 %v176_v57, %v176_v57  ;;  %v181_v63 = vmul.f32 %v175_v56, %v171_v58  ;;  %v182_v0 = vmul.f32 %v176_v57, %v174_v59 }
  0x72   : > { %v185_v1 = vmul.f32 %v175_v56, %v174_v59  ;;  %v186_v2 = vmul.f32 %v176_v57, %v171_v58  ;;  %v192_v8 = vmul.f32 %v191_v3, %v165_v54  ;;  %v196_v12 = vmul.f32 %v191_v3, %v166_v55 }
  0x73   : > { %v179_v62 = vadd.f32 %v178_v61, %v177_v60  ;;  %v183_v6 = vadd.f32 %v182_v0, %v181_v63 }
  0x74   : > { %v187_v7 = vsub.f32 %v185_v1, %v186_v2  ;;  %v194_v11 = vsub.f32 %v192_v8, %v193_v4  ;;  %v198_v20 = vadd.f32 %v197_v14, %v196_v12 }
  0x75   : > { %459 = vrcp.f32 %v179_v62 }
  0x76   : > { %v195_v19 = vadd.f32 %v194_v11, %v645_v13 }
  0x7b   : > { %v460_v5 = vpop.eup %459 }
  0x7c   : > { %v184_v9 = vmul.f32 %v460_v5, %v183_v6  ;;  %v188_v10 = vmul.f32 %v460_v5, %v187_v7 }
  0x7e   : > { %v189_v15 = vsub.f32 %v141_v30, %v184_v9  ;;  %v190_v16 = vsub.f32 %v142_v31, %v188_v10 }
  0x80   : > { %v199_v17 = vsub.f32 %v165_v54, %v189_v15  ;;  %v200_v18 = vsub.f32 %v166_v55, %v190_v16  ;;  %v215_v29 = vadd.f32 %v189_v15, %v654_v26  ;;  %v217_v30 = vmul.f32 %v190_v16, %v190_v16 }
  0x81   : > { %v221_v41 = vmul.f32 %v190_v16, %v189_v15 }
  0x82   : > { %v201_v21 = vmul.f32 %v199_v17, %v199_v17  ;;  %v202_v22 = vmul.f32 %v200_v18, %v200_v18  ;;  %v205_v24 = vmul.f32 %v199_v17, %v195_v19  ;;  %v206_v25 = vmul.f32 %v200_v18, %v198_v20 }
  0x83   : > { %v209_v27 = vmul.f32 %v199_v17, %v198_v20  ;;  %v210_v28 = vmul.f32 %v200_v18, %v195_v19  ;;  %v216_v34 = vmul.f32 %v215_v29, %v189_v15  ;;  %v220_v40 = vmul.f32 %v215_v29, %v190_v16 }
  0x84   : > { %v203_v23 = vadd.f32 %v202_v22, %v201_v21  ;;  %v207_v32 = vadd.f32 %v206_v25, %v205_v24 }
  0x85   : > { %v211_v33 = vsub.f32 %v209_v27, %v210_v28  ;;  %v218_v39 = vsub.f32 %v216_v34, %v217_v30  ;;  %v222_v47 = vadd.f32 %v221_v41, %v220_v40 }
  0x86   : > { %461 = vrcp.f32 %v203_v23 }
  0x87   : > { %v219_v46 = vadd.f32 %v218_v39, %v645_v13 }
  0x8c   : > { %v462_v31 = vpop.eup %461 }
  0x8d   : > { %v208_v35 = vmul.f32 %v462_v31, %v207_v32  ;;  %v212_v36 = vmul.f32 %v462_v31, %v211_v33 }
  0x8f   : > { %v687_v42 = vsub.f32 %v165_v54, %v208_v35  ;;  %v689_v43 = vsub.f32 %v166_v55, %v212_v36 }
  0x91   : > { %v223_v44 = vsub.f32 %v189_v15, %v687_v42  ;;  %v224_v45 = vsub.f32 %v190_v16, %v689_v43  ;;  %v239_v53 = vadd.f32 %v687_v42, %v654_v26  ;;  %v241_v57 = vmul.f32 %v689_v43, %v689_v43 }
  0x92   : > { %v245_v63 = vmul.f32 %v689_v43, %v687_v42 }
  0x93   : > { %v225_v48 = vmul.f32 %v223_v44, %v223_v44  ;;  %v226_v37 = vmul.f32 %v224_v45, %v224_v45  ;;  %v229_v49 = vmul.f32 %v223_v44, %v219_v46  ;;  %v230_v50 = vmul.f32 %v224_v45, %v222_v47 }
  0x94   : > { %v233_v51 = vmul.f32 %v223_v44, %v222_v47  ;;  %v234_v52 = vmul.f32 %v224_v45, %v219_v46  ;;  %v240_v56 = vmul.f32 %v239_v53, %v687_v42  ;;  %v244_v62 = vmul.f32 %v239_v53, %v689_v43 }
  0x95   : > { %v227_v38 = vadd.f32 %v226_v37, %v225_v48  ;;  %v231_v54 = vadd.f32 %v230_v50, %v229_v49 }
  0x96   : > { %v235_v55 = vsub.f32 %v233_v51, %v234_v52  ;;  %v242_v61 = vsub.f32 %v240_v56, %v241_v57  ;;  %v246_v7 = vadd.f32 %v245_v63, %v244_v62 }
  0x97   : > { %463 = vrcp.f32 %v227_v38 }
  0x98   : > { %v243_v6 = vadd.f32 %v242_v61, %v645_v13 }
  0x9d   : > { %v464_v58 = vpop.eup %463 }
  0x9e   : > { %v232_v59 = vmul.f32 %v464_v58, %v231_v54  ;;  %v236_v60 = vmul.f32 %v464_v58, %v235_v55 }
  0xa0   : > { %v237_v0 = vsub.f32 %v189_v15, %v232_v59  ;;  %v238_v1 = vsub.f32 %v190_v16, %v236_v60 }
  0xa2   : > { %v247_v2 = vsub.f32 %v687_v42, %v237_v0  ;;  %v248_v3 = vsub.f32 %v689_v43, %v238_v1  ;;  %v263_v14 = vadd.f32 %v237_v0, %v654_v26  ;;  %v265_v18 = vmul.f32 %v238_v1, %v238_v1 }
  0xa3   : > { %v269_v24 = vmul.f32 %v238_v1, %v237_v0 }
  0xa4   : > { %v249_v8 = vmul.f32 %v247_v2, %v247_v2  ;;  %v250_v4 = vmul.f32 %v248_v3, %v248_v3  ;;  %v253_v9 = vmul.f32 %v247_v2, %v243_v6  ;;  %v254_v10 = vmul.f32 %v248_v3, %v246_v7 }
  0xa5   : > { %v257_v11 = vmul.f32 %v247_v2, %v246_v7  ;;  %v258_v12 = vmul.f32 %v248_v3, %v243_v6  ;;  %v264_v16 = vmul.f32 %v263_v14, %v237_v0  ;;  %v268_v23 = vmul.f32 %v263_v14, %v238_v1 }
  0xa6   : > { %v251_v5 = vadd.f32 %v250_v4, %v249_v8  ;;  %v255_v17 = vadd.f32 %v254_v10, %v253_v9 }
  0xa7   : > { %v259_v15 = vsub.f32 %v257_v11, %v258_v12  ;;  %v266_v22 = vsub.f32 %v264_v16, %v265_v18  ;;  %v270_v33 = vadd.f32 %v269_v24, %v268_v23 }
  0xa8   : > { %465 = vrcp.f32 %v251_v5 }
  0xa9   : > { %v267_v32 = vadd.f32 %v266_v22, %v645_v13 }
  0xae   : > { %v466_v19 = vpop.eup %465 }
  0xaf   : > { %v256_v20 = vmul.f32 %v466_v19, %v255_v17  ;;  %v260_v21 = vmul.f32 %v466_v19, %v259_v15 }
  0xb1   : > { %v261_v25 = vsub.f32 %v687_v42, %v256_v20   ;;  %v262_v27 = vsub.f32 %v689_v43, %v260_v21  }
  0xb3   : > { %v271_v28 = vsub.f32 %v237_v0, %v261_v25  ;;  %v272_v29 = vsub.f32 %v238_v1, %v262_v27  ;;  %v287_v45 = vsub.f32 %v261_v25, %v687_v42  ;;  %v288_v46 = vsub.f32 %v262_v27, %v689_v43 }
  0xb5   : > { %v273_v34 = vmul.f32 %v271_v28, %v271_v28  ;;  %v274_v30 = vmul.f32 %v272_v29, %v272_v29  ;;  %v277_v35 = vmul.f32 %v271_v28, %v267_v32  ;;  %v278_v36 = vmul.f32 %v272_v29, %v270_v33 }
  0xb6   : > { %v281_v39 = vmul.f32 %v271_v28, %v270_v33  ;;  %v282_v40 = vmul.f32 %v272_v29, %v267_v32  ;;  %v289_v38 = vmul.f32 %v287_v45, %v287_v45  ;;  %v290_v51 = vmul.f32 %v288_v46, %v288_v46 }
  0xb7   : > { %v275_v31 = vadd.f32 %v274_v30, %v273_v34  ;;  %v279_v41 = vadd.f32 %v278_v36, %v277_v35  ;;  %v750_v36 = vmov %v261_v25 }
  0xb8   : > { %v283_v44 = vsub.f32 %v281_v39, %v282_v40  ;;  %v291_v54 = vadd.f32 %v290_v51, %v289_v38  ;;  %v748_v39 = vmov %v262_v27 }
  0xb9   : > { %467 = vrcp.f32 %v275_v31 }
  0xbf   : > { %v468_v47 = vpop.eup %467 }
  0xc0   : > { %v280_v48 = vmul.f32 %v468_v47, %v279_v41  ;;  %v284_v37 = vmul.f32 %v468_v47, %v283_v44 }
  0xc2   : > { %v285_v49 = vsub.f32 %v237_v0, %v280_v48   ;;  %v286_v50 = vsub.f32 %v238_v1, %v284_v37  }
  0xc4   : > { %v292_v52 = vsub.f32 %v285_v49, %v237_v0  ;;  %v293_v53 = vsub.f32 %v286_v50, %v238_v1  ;;  %v747_v38 = vmov %v286_v50  ;;  %v749_v37 = vmov %v285_v49 }
  0xc6   : > { %v294_v55 = vmul.f32 %v292_v52, %v292_v52  ;;  %v295_v56 = vmul.f32 %v293_v53, %v293_v53 }
  0xc8   : > { %v296_v57 = vadd.f32 %v295_v56, %v294_v55 }
  0xca   : > { %v297_v58 = vmax.f32 %v291_v54, %v296_v57 }
  0xcc   : > { %80 = vmax.xlane.f32.xlu0 %v297_v58 }
 0x13f   : > { %v81_v42 = vpop.xlane.xlu0 %80 }
 0x140   : > { %v82_v59 = vrot.slane %v81_v42, 4 }
 0x142   : > { %v83_v43 = vmax.f32 %v81_v42, %v82_v59 }
 0x144   : > { %v84_v60 = vrot.slane %v83_v43, 2 }
 0x146   : > { %v85_v61 = vmax.f32 %v83_v43, %v84_v60 }
 0x148   : > { %v86_v62 = vrot.slane %v85_v61, 1 }
 0x14a   : > { %v87_v63 = vmax.f32 %v85_v61, %v86_v62 }
 0x14c   : > { %395 = vpush %v87_v63 }
 0x17d   : > { %s396_s19 = spop %395 }
 0x17e   : > { %p89_p2 = scmp.gt.f32.partialorder %s396_s19, 1e-28 }
 0x180   : > { %p90_p3 = por %p89_p2, %p79_p0 }
 0x182   : > { %p91_p4 = pnand %p90_p3, %p78_p1 }
 0x183   :  { %300 = vst [vmem:[#allocation6] sm:$0xff] (%p91_p4), %v262_v27  ;;  %vm305_vm6 = vcmp.le.f32.partialorder (%p91_p4), %v297_v58, 1e-28  ;;  %s328_s22 = sshll.u32 (%p91_p4), %s741_s2, 4  ;;  %v615_v0 = vmov (%p91_p4), 0.0   ;;  %s616_s23 = smov (%p91_p4), [#allocation6]   ;;  %s329_s22 = int_to_ptr.hbm [resolvable:$true] %s328_s22 }
 0x184   :  { %94 = sbr.rel (!%p91_p4) target bundleno = 59 (0x3b), region = 53  ;;  %304 = vst [vmem:[#allocation6 + $0x8] sm:$0xff] (%p91_p4), %v286_v50  ;;  %v394_v1 = vsel (%p91_p4), %vm305_vm6, 1.0, %v615_v0  ;;  %s326_s24 = sshll.u32 (%p91_p4), %s616_s23, 4  ;;  %s327_s24 = int_to_ptr.vmem [resolvable:$true] %s326_s24 }
 0x185   :  { %299 = vst [vmem:[#allocation5] sm:$0xff] (%p91_p4), %v261_v25  ;;  %334 = dma.vmem_to_hbm [thread:$0]  (%p91_p4), %s327_s24, 256, %s329_s22, [#allocation7], %s612_s17, %s612_s17, %s613_s18  }
 0x186   :  { %302 = vst [vmem:[#allocation5 + $0x8] sm:$0xff] (%p91_p4), %v285_v49  ;;  %s617_s25 = smov (%p91_p4), [#allocation5]   ;;  %s315_s2 = sshll.u32 (%p91_p4), %s740_s1, 4  ;;  %s316_s2 = int_to_ptr.hbm [resolvable:$true] %s315_s2 }
 0x187   :  { %308 = vst [vmem:[#allocation8] sm:$0xff] (%p91_p4), %v394_v1  ;;  %s313_s26 = sshll.u32 (%p91_p4), %s617_s25, 4  ;;  %s342_s4 = sshll.u32 (%p91_p4), %s742_s3, 4  ;;  %s314_s26 = int_to_ptr.vmem [resolvable:$true] %s313_s26  ;;  %s343_s4 = int_to_ptr.hbm [resolvable:$true] %s342_s4 }
 0x188   :  { %321 = dma.vmem_to_hbm [thread:$0]  (%p91_p4), %s314_s26, 256, %s316_s2, [#allocation4], %s612_s17, %s612_s17, %s613_s18  }
 0x189   :  { %s618_s5 = smov [#allocation8]  }
 0x18a   :  { %s340_s6 = sshll.u32 %s618_s5, 4  ;;  %s341_s6 = int_to_ptr.vmem [resolvable:$true] %s340_s6 }
 0x18b   :  { %345 = dma.vmem_to_hbm [thread:$0]  %s341_s6, 128, %s343_s4, [#allocation7]  }
 0x18c   :  { %587 = dma.done.wait [#allocation4], 256  }
 0x18d   :  { %588 = vsyncadd [#allocation4], 4294967040 }
 0x18e   :  { %589 = dma.done.wait [#allocation7], 384  }
 0x18f   :  { %590 = vsyncadd [#allocation7], 4294966912 }
 0x190   :  { %358 = vsyncpa [#allocation3], 1 }
 0x191   :  { %359 = vsyncpa [#allocation4], 1 }
 0x192   :  { %360 = vsyncpa [#allocation7], 1 }

</bundles_post_ra>
